<compile_context>
chip_gen: v5e
topology: v5e:2x2
jax: 0.10.0
libtpu: 0.0.40
codegen_flags: <defaults>
</compile_context>

<pallas_src>
import functools

import numpy as np

import jax
import jax.numpy as jnp
from jax.experimental import pallas as pl
from jax.experimental.pallas import tpu as pltpu

RMS_EPS = 1e-6


def _round_up(a, b):
    return ((a + b - 1) // b) * b


def _lm_head_kernel(x_ref, g_ref, w_ref, o_ref, normed_ref, *, eps):
    # x_ref      : (TM, H)   token tile (input dtype)
    # g_ref      : (1,  H)   RMSNorm gamma
    # w_ref      : (TV, H)   lm_head weight tile, PyTorch [V, H] layout, bf16
    # o_ref      : (TM, TV)  logits tile (lane-dense in V)
    # normed_ref : (TM, H)   bf16 VMEM scratch, persists across the vocab axis
    @pl.when(pl.program_id(1) == 0)
    def _():
        # RMSNorm hoisted: computed once per M tile, reused for all V tiles.
        x = x_ref[...].astype(jnp.float32)
        var = jnp.mean(x * x, axis=-1, keepdims=True)
        normed = x * jax.lax.rsqrt(var + eps)
        normed = normed * g_ref[...].astype(jnp.float32)
        normed_ref[...] = normed.astype(normed_ref.dtype)

    # bf16 MXU matmul, fp32 accumulation; contract H of both operands so the
    # weight can stay in [V, H] layout (no transpose copy in HBM).
    o_ref[...] = jax.lax.dot_general(
        normed_ref[...],
        w_ref[...],
        dimension_numbers=(((1,), (1,)), ((), ())),
        preferred_element_type=jnp.float32,
    ).astype(o_ref.dtype)


def lm_head_forward(hidden_states, norm_weight, lm_head_weight, *,
                    tm=256, tv=512, out_dtype=jnp.float32):
    """hidden_states: [B, S, H]; norm_weight: [H]; lm_head_weight: [V, H]."""
    B, S, H = hidden_states.shape
    V, H2 = lm_head_weight.shape
    assert H == H2

    M = B * S
    TM = min(tm, _round_up(M, 8))        # token tile (multiple of 8)
    M_pad = _round_up(M, TM)
    TV = min(tv, _round_up(V, 128))      # vocab tile (multiple of 128)
    V_pad = _round_up(V, TV)

    x2d = hidden_states.reshape(M, H)
    if M_pad != M:
        x2d = jnp.pad(x2d, ((0, M_pad - M), (0, 0)))

    # Stream the vocab matrix in bf16: halves HBM traffic and hits the bf16 MXU.
    w = lm_head_weight.astype(jnp.bfloat16)
    if V_pad != V:
        w = jnp.pad(w, ((0, V_pad - V), (0, 0)))

    gamma = norm_weight.reshape(1, H).astype(jnp.float32)

    # Rough VMEM budget: double-buffered x / weight / output tiles + scratch.
    vmem_bytes = (
        2 * TM * H * x2d.dtype.itemsize          # x tiles (double buffered)
        + TM * H * 2                             # bf16 normed scratch
        + 2 * TV * H * 2                         # bf16 weight tiles (double buffered)
        + 2 * TM * TV * np.dtype(out_dtype).itemsize   # output tiles
        + 4 * H * 4                              # gamma + slack
    )
    vmem_limit = min(int(vmem_bytes * 1.5) + (1 << 20), 100 * 1024 * 1024)

    out = pl.pallas_call(
        functools.partial(_lm_head_kernel, eps=RMS_EPS),
        out_shape=jax.ShapeDtypeStruct((M_pad, V_pad), out_dtype),
        grid_spec=pltpu.PrefetchScalarGridSpec(
            num_scalar_prefetch=0,
            grid=(M_pad // TM, V_pad // TV),      # vocab axis innermost
            in_specs=[
                pl.BlockSpec((TM, H), lambda i, j: (i, 0)),   # token tile
                pl.BlockSpec((1, H), lambda i, j: (0, 0)),    # gamma (tiny)
                pl.BlockSpec((TV, H), lambda i, j: (j, 0)),   # weight tile [V, H]
            ],
            out_specs=pl.BlockSpec((TM, TV), lambda i, j: (i, j)),
            scratch_shapes=[pltpu.VMEM((TM, H), jnp.bfloat16)],
        ),
        compiler_params=pltpu.CompilerParams(
            dimension_semantics=("parallel", "arbitrary"),
            vmem_limit_bytes=vmem_limit,
        ),
    )(x2d, gamma, w)

    if M_pad != M or V_pad != V:
        out = out[:M, :V]
    return out.reshape(B, S, V)


def lm_head_reference(hidden_states, norm_weight, lm_head_weight, eps=RMS_EPS):
    # Mirrors the kernel's precision path: fp32 RMSNorm, bf16 normed/weight,
    # fp32-accumulated matmul.
    x = hidden_states.astype(jnp.float32)
    var = jnp.mean(x * x, axis=-1, keepdims=True)
    normed = x * jax.lax.rsqrt(var + eps) * norm_weight.astype(jnp.float32)
    normed = normed.astype(jnp.bfloat16).astype(jnp.float32)
    w = lm_head_weight.astype(jnp.bfloat16).astype(jnp.float32)
    return jnp.einsum("bsh,vh->bsv", normed, w)


if __name__ == "__main__":
    # Small, tile-friendly shapes consistent with the module's forward:
    # hidden_states [B, S, H] -> logits [B, S, V]
    B, S, H, V = 2, 8, 128, 512

    key = jax.random.PRNGKey(0)
    k_x, k_g, k_w = jax.random.split(key, 3)

    hidden_states = jax.random.normal(k_x, (B, S, H), dtype=jnp.float32)
    norm_weight = 1.0 + 0.01 * jax.random.normal(k_g, (H,), dtype=jnp.float32)
    lm_head_weight = (
        jax.random.normal(k_w, (V, H), dtype=jnp.float32)
        / jnp.sqrt(H).astype(jnp.float32)
    )

    logits = lm_head_forward(hidden_states, norm_weight, lm_head_weight)
    logits = jax.block_until_ready(logits)

    ref = lm_head_reference(hidden_states, norm_weight, lm_head_weight)
    assert logits.shape == (B, S, V)
    assert jnp.allclose(logits, ref, atol=2e-2, rtol=2e-2), "mismatch vs reference"

    print("KERNEL_OK")
</pallas_src>

<mosaic_0001>
module attributes {stable_mosaic.version = 11 : i64} {
  func.func @_lm_head_kernel(%arg0: i32, %arg1: i32, %arg2: memref<16x128xf32, #tpu.memory_space<vmem>>, %arg3: memref<1x128xf32, #tpu.memory_space<vmem>>, %arg4: memref<512x128xbf16, #tpu.memory_space<vmem>>, %arg5: memref<16x512xf32, #tpu.memory_space<vmem>>, %arg6: memref<16x128xbf16, #tpu.memory_space<vmem>>) attributes {dimension_semantics = [#tpu.dimension_semantics<parallel>, #tpu.dimension_semantics<arbitrary>], iteration_bounds = array<i64: 1, 1>, scalar_prefetch = 0 : i64, scratch_operands = 1 : i64, tpu.core_type = #tpu.core_type<tc>, window_params = [{transform_indices = @transform_0, window_bounds = array<i64: 16, 128>}, {pipeline_mode = #tpu.pipeline_mode<synchronous>, transform_indices = @transform_1, window_bounds = array<i64: 1, 128>}, {transform_indices = @transform_2, window_bounds = array<i64: 512, 128>}, {transform_indices = @transform_3, window_bounds = array<i64: 16, 512>}]} {
    %c0_i32 = arith.constant 0 : i32
    %0 = arith.cmpi eq, %arg1, %c0_i32 : i32
    %1 = arith.extui %0 : i1 to i32
    %c0_i32_0 = arith.constant 0 : i32
    %2 = arith.cmpi ne, %1, %c0_i32_0 : i32
    scf.if %2 {
      %c0_6 = arith.constant 0 : index
      %c0_7 = arith.constant 0 : index
      %7 = vector.load %arg2[%c0_6, %c0_7] : memref<16x128xf32, #tpu.memory_space<vmem>>, vector<16x128xf32>
      %8 = arith.mulf %7, %7 : vector<16x128xf32>
      %cst_8 = arith.constant dense<0.000000e+00> : vector<16xf32>
      %9 = vector.multi_reduction <add>, %8, %cst_8 [1] : vector<16x128xf32> to vector<16xf32>
      %10 = vector.shape_cast %9 : vector<16xf32> to vector<16x1xf32>
      %cst_9 = arith.constant 1.280000e+02 : f32
      %11 = vector.broadcast %cst_9 : f32 to vector<16x1xf32>
      %12 = arith.divf %10, %11 : vector<16x1xf32>
      %cst_10 = arith.constant 9.99999997E-7 : f32
      %13 = vector.broadcast %cst_10 : f32 to vector<16x1xf32>
      %14 = arith.addf %12, %13 : vector<16x1xf32>
      %15 = math.rsqrt %14 : vector<16x1xf32>
      %16 = vector.broadcast %15 : vector<16x1xf32> to vector<16x128xf32>
      %17 = arith.mulf %7, %16 : vector<16x128xf32>
      %c0_11 = arith.constant 0 : index
      %c0_12 = arith.constant 0 : index
      %18 = vector.load %arg3[%c0_11, %c0_12] : memref<1x128xf32, #tpu.memory_space<vmem>>, vector<1x128xf32>
      %19 = vector.broadcast %18 : vector<1x128xf32> to vector<16x128xf32>
      %20 = arith.mulf %17, %19 : vector<16x128xf32>
      %21 = arith.truncf %20 : vector<16x128xf32> to vector<16x128xbf16>
      %c0_13 = arith.constant 0 : index
      %c0_14 = arith.constant 0 : index
      %22 = vector.load %arg6[%c0_13, %c0_14] : memref<16x128xbf16, #tpu.memory_space<vmem>>, vector<16x128xbf16>
      tpu.vector_store %arg6[%c0_13, %c0_14], %21 {strides = array<i32>} : memref<16x128xbf16, #tpu.memory_space<vmem>>, vector<16x128xbf16>,
    } else {
    }
    %c0 = arith.constant 0 : index
    %c0_1 = arith.constant 0 : index
    %3 = vector.load %arg6[%c0, %c0_1] : memref<16x128xbf16, #tpu.memory_space<vmem>>, vector<16x128xbf16>
    %c0_2 = arith.constant 0 : index
    %c0_3 = arith.constant 0 : index
    %4 = vector.load %arg4[%c0_2, %c0_3] : memref<512x128xbf16, #tpu.memory_space<vmem>>, vector<512x128xbf16>
    %cst = arith.constant dense<0.000000e+00> : vector<16x512xf32>
    %5 = tpu.matmul %3, %4, %cst {dimension_numbers = #tpu.dot_dimension_numbers<[1], [1], [0], [0], [0, 0, 1, 0], [], []>} : vector<16x128xbf16>, vector<512x128xbf16>, vector<16x512xf32> -> vector<16x512xf32>
    %c0_4 = arith.constant 0 : index
    %c0_5 = arith.constant 0 : index
    %6 = vector.load %arg5[%c0_4, %c0_5] : memref<16x512xf32, #tpu.memory_space<vmem>>, vector<16x512xf32>
    tpu.vector_store %arg5[%c0_4, %c0_5], %5 {strides = array<i32>} : memref<16x512xf32, #tpu.memory_space<vmem>>, vector<16x512xf32>,
    return
  }
  func.func @transform_0(%arg0: i32, %arg1: i32) -> (i32, i32) {
    %c0_i32 = arith.constant 0 : i32
    %c0_i32_0 = arith.constant 0 : i32
    return %arg0, %c0_i32 : i32, i32
  }
  func.func @transform_1(%arg0: i32, %arg1: i32) -> (i32, i32) {
    %c0_i32 = arith.constant 0 : i32
    %c0_i32_0 = arith.constant 0 : i32
    %c0_i32_1 = arith.constant 0 : i32
    return %c0_i32, %c0_i32_0 : i32, i32
  }
  func.func @transform_2(%arg0: i32, %arg1: i32) -> (i32, i32) {
    %c0_i32 = arith.constant 0 : i32
    %c0_i32_0 = arith.constant 0 : i32
    return %arg1, %c0_i32 : i32, i32
  }
  func.func @transform_3(%arg0: i32, %arg1: i32) -> (i32, i32) {
    %c0_i32 = arith.constant 0 : i32
    return %arg0, %arg1 : i32, i32
  }
}

</mosaic_0001>

<bundles_post_ra>
// kernel: tpu_custom_call.1
= control target key start
LH: loop header
LB: loop body
LE: loop exit
PB: predicated region body
PF: predicated region fallthrough
CT: control target
= control target key end

     0   :  { %8 = vsyncpa [#allocation4], 0  ;;  %s806_s0 = inlined_call_operand.hbm [shape: f32[16,128], index: 0, kind: input, shape index: {}]   ;;  %s807_s1 = inlined_call_operand.hbm [shape: f32[1,128], index: 1, kind: input, shape index: {}]   ;;  %s808_s2 = inlined_call_operand.hbm [shape: bf16[512,128], index: 2, kind: input, shape index: {}]   ;;  %s809_s3 = inlined_call_operand.hbm [shape: f32[16,512], index: 3, kind: output, shape index: {}]  }
   0x1   :  { %9 = vsyncpa [#allocation7], 0  ;;  %s29_s14 = sshll.u32 %s807_s1, 4  ;;  %s30_s14 = int_to_ptr.hbm [resolvable:$true] %s29_s14 }
   0x2   :  { %10 = vsyncpa [#allocation5], 0  ;;  %s753_s15 = smov [#allocation6]   ;;  %s15_s19 = sshll.u32 %s806_s0, 4  ;;  %s16_s19 = int_to_ptr.hbm [resolvable:$true] %s15_s19 }
   0x3   :  { %s31_s16 = sshll.u32 %s753_s15, 4  ;;  %s754_s20 = smov [#allocation3]   ;;  %s32_s16 = int_to_ptr.vmem [resolvable:$true] %s31_s16 }
   0x4   :  { %34 = dma.hbm_to_vmem [thread:$0]  %s30_s14, 16, %s32_s16, [#allocation7]  }
   0x5   :  { %s17_s21 = sshll.u32 %s754_s20, 4  ;;  %s755_s22 = smov 128   ;;  %s18_s21 = int_to_ptr.vmem [resolvable:$true] %s17_s21 }
   0x6   :  { %s756_s23 = smov 8   ;;  %s39_s1 = sshll.u32 %s808_s2, 4  ;;  %s40_s1 = int_to_ptr.hbm [resolvable:$true] %s39_s1 }
   0x7   :  { %23 = dma.hbm_to_vmem [thread:$0]  %s16_s19, 256, %s18_s21, [#allocation4], %s755_s22, %s755_s22, %s756_s23  }
   0x8   :  { %s757_s26 = smov [#allocation8]   ;;  %s758_s28 = smov 64  }
   0x9   :  { %s41_s27 = sshll.u32 %s757_s26, 4  ;;  %s759_s29 = smov 4   ;;  %s42_s27 = int_to_ptr.vmem [resolvable:$true] %s41_s27 }
   0xa   :  { %47 = dma.hbm_to_vmem [thread:$0]  %s40_s1, 4096, %s42_s27, [#allocation7], %s758_s28, %s758_s28, %s759_s29  }
   0xb   :  { %747 = dma.done.wait [#allocation4], 256  }
   0xc   :  { %748 = vsyncadd [#allocation4], 4294967040 }
   0xd   :  { %749 = dma.done.wait [#allocation7], 4112  }
   0xe   :  { %750 = vsyncadd [#allocation7], 4294963184  ;;  %v793_v0 = vld [vmem:[#allocation3] sm:$0xff]  ;;  %v603_v1 = vld [vmem:[#allocation8 + $0x38] sm:$0xff]  ;;  %v760_v16 = vmov 128.0   ;;  %s761_s0 = smov [#allocation9]  }
   0xf   :  { %v66_v2 = vmul.f32 %v793_v0, %v793_v0  ;;  %v611_v3 = vld [vmem:[#allocation8 + $0x78] sm:$0xff]  ;;  %379 = vmatpush.bf16.xpose.msra.mxu0 %v603_v1  ;;  %v602_v7 = vld [vmem:[#allocation8 + $0x30] sm:$0xff]  ;;  %v601_v12 = vld [vmem:[#allocation8 + $0x28] sm:$0xff]  ;;  %645 = vrcp.f32 %v760_v16  ;;  %s447_s2 = sshll.u32 %s761_s0, 4  ;;  %s449_s5 = sshll.u32 %s809_s3, 4  ;;  %s448_s2 = int_to_ptr.vmem [resolvable:$true] %s447_s2  ;;  %s450_s5 = int_to_ptr.hbm [resolvable:$true] %s449_s5 }
  0x10   :  { %v619_v4 = vld [vmem:[#allocation8 + $0xb8] sm:$0xff]  ;;  %393 = vmatpush.bf16.xpose.msra.mxu1 %v611_v3  ;;  %v610_v9 = vld [vmem:[#allocation8 + $0x70] sm:$0xff]  ;;  %v609_v13 = vld [vmem:[#allocation8 + $0x68] sm:$0xff]  ;;  %s762_s6 = smov 512   ;;  %s763_s7 = smov 32  }
  0x11   :  { %v627_v5 = vld [vmem:[#allocation8 + $0xf8] sm:$0xff]  ;;  %68 = vadd.xlane.f32.xlu0 %v66_v2  ;;  %407 = vmatpush.bf16.xpose.msra.mxu2 %v619_v4  ;;  %v618_v10 = vld [vmem:[#allocation8 + $0xb0] sm:$0xff]  ;;  %v617_v14 = vld [vmem:[#allocation8 + $0xa8] sm:$0xff] }
  0x12   :  { %v797_v6 = vld [vmem:[#allocation3 + $0x8] sm:$0xff]  ;;  %421 = vmatpush.bf16.xpose.msra.mxu3 %v627_v5  ;;  %v625_v15 = vld [vmem:[#allocation8 + $0xe8] sm:$0xff]  ;;  %v600_v17 = vld [vmem:[#allocation8 + $0x20] sm:$0xff] }
  0x13   :  { %v67_v8 = vmul.f32 %v797_v6, %v797_v6  ;;  %v626_v11 = vld [vmem:[#allocation8 + $0xf0] sm:$0xff]  ;;  %v608_v18 = vld [vmem:[#allocation8 + $0x60] sm:$0xff]  ;;  %v599_v22 = vld [vmem:[#allocation8 + $0x18] sm:$0xff] }
  0x14   :  { %v616_v19 = vld [vmem:[#allocation8 + $0xa0] sm:$0xff]  ;;  %v607_v23 = vld [vmem:[#allocation8 + $0x58] sm:$0xff]  ;;  %v598_v28 = vld [vmem:[#allocation8 + $0x10] sm:$0xff] }
  0x15   :  { %v624_v20 = vld [vmem:[#allocation8 + $0xe0] sm:$0xff]  ;;  %v646_v21 = vpop.eup %645  ;;  %v615_v24 = vld [vmem:[#allocation8 + $0x98] sm:$0xff]  ;;  %v606_v29 = vld [vmem:[#allocation8 + $0x50] sm:$0xff] }
  0x16   :  { %v73_v25 = vmul.f32 128.0, %v646_v21  ;;  %v623_v26 = vld [vmem:[#allocation8 + $0xd8] sm:$0xff]  ;;  %v614_v30 = vld [vmem:[#allocation8 + $0x90] sm:$0xff]  ;;  %vm77_vm0 = vweird.f32 %v646_v21  ;;  %v597_v34 = vld [vmem:[#allocation8 + $0x8] sm:$0xff] }
  0x17   :  { %380 = vmatpush.bf16.xpose.msra.mxu0 %v602_v7  ;;  %v622_v32 = vld [vmem:[#allocation8 + $0xd0] sm:$0xff]  ;;  %v605_v35 = vld [vmem:[#allocation8 + $0x48] sm:$0xff]  ;;  %v596_v42 = vld [vmem:[#allocation8] sm:$0xff] }
  0x18   :  { %394 = vmatpush.bf16.xpose.msra.mxu1 %v610_v9  ;;  %v74_v27 = vsub.f32 1.0, %v73_v25  ;;  %v613_v36 = vld [vmem:[#allocation8 + $0x88] sm:$0xff]  ;;  %v604_v43 = vld [vmem:[#allocation8 + $0x40] sm:$0xff]  ;;  %v644_v62 = vld [vmem:[#allocation6] ss:$0 sm:$0xff] }
  0x19   :  { %70 = vadd.xlane.f32.xlu0 %v67_v8  ;;  %408 = vmatpush.bf16.xpose.msra.mxu2 %v618_v10  ;;  %v621_v38 = vld [vmem:[#allocation8 + $0xc8] sm:$0xff]  ;;  %v612_v44 = vld [vmem:[#allocation8 + $0x80] sm:$0xff] }
  0x1a   :  { %422 = vmatpush.bf16.xpose.msra.mxu3 %v626_v11  ;;  %v75_v31 = vmul.f32 %v646_v21, %v74_v27  ;;  %v620_v45 = vld [vmem:[#allocation8 + $0xc0] sm:$0xff] }
  0x1c   :  { %v76_v33 = vadd.f32 %v646_v21, %v75_v31 }
  0x1e   :  { %v78_v37 = vsel %vm77_vm0, %v646_v21, %v76_v33 }
  0x1f   :  { %381 = vmatpush.bf16.xpose.msra.mxu0 %v601_v12 }
  0x20   :  { %395 = vmatpush.bf16.xpose.msra.mxu1 %v609_v13 }
  0x21   :  { %409 = vmatpush.bf16.xpose.msra.mxu2 %v617_v14 }
  0x22   :  { %423 = vmatpush.bf16.xpose.msra.mxu3 %v625_v15 }
  0x27   :  { %382 = vmatpush.bf16.xpose.msra.mxu0 %v600_v17 }
  0x28   :  { %396 = vmatpush.bf16.xpose.msra.mxu1 %v608_v18 }
  0x29   :  { %410 = vmatpush.bf16.xpose.msra.mxu2 %v616_v19 }
  0x2a   :  { %424 = vmatpush.bf16.xpose.msra.mxu3 %v624_v20 }
  0x2f   :  { %383 = vmatpush.bf16.xpose.msra.mxu0 %v599_v22 }
  0x30   :  { %397 = vmatpush.bf16.xpose.msra.mxu1 %v607_v23 }
  0x31   :  { %411 = vmatpush.bf16.xpose.msra.mxu2 %v615_v24 }
  0x32   :  { %425 = vmatpush.bf16.xpose.msra.mxu3 %v623_v26 }
  0x37   :  { %384 = vmatpush.bf16.xpose.msra.mxu0 %v598_v28 }
  0x38   :  { %398 = vmatpush.bf16.xpose.msra.mxu1 %v606_v29 }
  0x39   :  { %412 = vmatpush.bf16.xpose.msra.mxu2 %v614_v30 }
  0x3a   :  { %426 = vmatpush.bf16.xpose.msra.mxu3 %v622_v32 }
  0x3f   :  { %385 = vmatpush.bf16.xpose.msra.mxu0 %v597_v34 }
  0x40   :  { %399 = vmatpush.bf16.xpose.msra.mxu1 %v605_v35 }
  0x41   :  { %413 = vmatpush.bf16.xpose.msra.mxu2 %v613_v36 }
  0x42   :  { %427 = vmatpush.bf16.xpose.msra.mxu3 %v621_v38 }
  0x47   :  { %386 = vmatpush.bf16.xpose.msra.mxu0 %v596_v42 }
  0x48   :  { %400 = vmatpush.bf16.xpose.msra.mxu1 %v604_v43 }
  0x49   :  { %414 = vmatpush.bf16.xpose.msra.mxu2 %v612_v44 }
  0x4a   :  { %428 = vmatpush.bf16.xpose.msra.mxu3 %v620_v45 }
  0x84   :  { %v69_v39 = vpop.xlane.xlu0 %68 }
  0x85   :  { %v79_v40 = vmul.f32 %v78_v37, %v69_v39 }
  0x87   :  { %v81_v41 = vadd.f32 1e-06, %v79_v40 }
  0x89   :  { %647 = vrsqrt.f32 %v81_v41  ;;  %vm89_vm2 = vweird.f32 %v81_v41 }
  0x8c   :  { %v71_v46 = vpop.xlane.xlu0 %70 }
  0x8d   :  { %v80_v47 = vmul.f32 %v78_v37, %v71_v46 }
  0x8f   :  { %v648_v48 = vpop.eup %647  ;;  %v82_v49 = vadd.f32 1e-06, %v80_v47 }
  0x90   :  { %v84_v50 = vmul.f32 %v648_v48, %v81_v41  ;;  %vm90_vm1 = vweird.f32 %v648_v48 }
  0x91   :  { %649 = vrsqrt.f32 %v82_v49  ;;  %vm91_vm3 = vmor %vm89_vm2, %vm90_vm1  ;;  %vm99_vm5 = vweird.f32 %v82_v49 }
  0x92   :  { %v85_v51 = vmul.f32 %v648_v48, %v84_v50 }
  0x94   :  { %v86_v52 = vmul.f32 0.5, %v85_v51 }
  0x96   :  { %v87_v53 = vsub.f32 1.5, %v86_v52 }
  0x97   :  { %v650_v54 = vpop.eup %649 }
  0x98   :  { %v94_v55 = vmul.f32 %v650_v54, %v82_v49  ;;  %v88_v56 = vmul.f32 %v648_v48, %v87_v53  ;;  %vm100_vm4 = vweird.f32 %v650_v54 }
  0x99   :  { %vm101_vm6 = vmor %vm99_vm5, %vm100_vm4 }
  0x9a   :  { %v95_v57 = vmul.f32 %v650_v54, %v94_v55  ;;  %v92_v59 = vsel %vm91_vm3, %v648_v48, %v88_v56 }
  0x9b   :  { %v103_v63 = vmul.f32 %v92_v59, %v793_v0 }
  0x9c   :  { %v96_v58 = vmul.f32 0.5, %v95_v57 }
  0x9d   :  { %v109_v3 = vmul.f32 %v644_v62, %v103_v63 }
  0x9e   :  { %v97_v60 = vsub.f32 1.5, %v96_v58 }
  0xa0   :  { %v98_v61 = vmul.f32 %v650_v54, %v97_v60 }
  0xa2   :  { %v102_v1 = vsel %vm101_vm6, %v650_v54, %v98_v61 }
  0xa3   :  { %v104_v2 = vmul.f32 %v102_v1, %v797_v6 }
  0xa5   :  { %v110_v4 = vmul.f32 %v644_v62, %v104_v2 }
  0xa7   :  { %v631_v5 = vpack.c.bf16 %v110_v4, %v109_v3 }
  0xa9   :  { %632 = vst [vmem:[#allocation2] sm:$0xff] %v631_v5  }
  0xb0   :  { %v595_v7 = vld [vmem:[#allocation2] sm:$0xff] }
  0xb1   :  { %387 = vmatmul.bf16.vlgmr.msra.gmra.mxu0 %v595_v7  ;;  %401 = vmatmul.bf16.vlgmr.msra.gmra.mxu1 %v595_v7 }
  0xb2   :  { %415 = vmatmul.bf16.vlgmr.msra.gmra.mxu2 %v595_v7  ;;  %429 = vmatmul.bf16.vlgmr.msra.gmra.mxu3 %v595_v7 }
 0x12e   :  { %v388_v8 = vpop.f32.mrf.mxu0  ;;  %v402_v9 = vpop.f32.mrf.mxu1 }
 0x12f   :  { %435 = vst [vmem:[#allocation9] sm:$0xff] %v388_v8 }
 0x130   :  { %436 = vst [vmem:[#allocation9 + $0x8] sm:$0xff] %v402_v9 }
 0x135   :  { %v416_v10 = vpop.f32.mrf.mxu2  ;;  %v430_v11 = vpop.f32.mrf.mxu3 }
 0x136   :  { %437 = vst [vmem:[#allocation9 + $0x10] sm:$0xff] %v416_v10  ;;  %v390_v0 = vpop.f32.mrf.mxu0  ;;  %v404_v12 = vpop.f32.mrf.mxu1 }
 0x137   :  { %438 = vst [vmem:[#allocation9 + $0x18] sm:$0xff] %v430_v11 }
 0x138   :  { %439 = vst [vmem:[#allocation9 + $0x20] sm:$0xff] %v390_v0 }
 0x139   :  { %440 = vst [vmem:[#allocation9 + $0x28] sm:$0xff] %v404_v12 }
 0x13d   :  { %v418_v6 = vpop.f32.mrf.mxu2  ;;  %v432_v13 = vpop.f32.mrf.mxu3 }
 0x13e   :  { %441 = vst [vmem:[#allocation9 + $0x30] sm:$0xff] %v418_v6 }
 0x13f   :  { %442 = vst [vmem:[#allocation9 + $0x38] sm:$0xff] %v432_v13 }
 0x140   :  { %455 = dma.vmem_to_hbm [thread:$0]  %s448_s2, 1024, %s450_s5, [#allocation5], %s762_s6, %s762_s6, %s763_s7  }
 0x141   :  { %751 = dma.done.wait [#allocation5], 1024  }
 0x142   :  { %752 = vsyncadd [#allocation5], 4294966272 }
 0x143   :  { %460 = vsyncpa [#allocation4], 1 }
 0x144   :  { %461 = vsyncpa [#allocation7], 1 }
 0x145   :  { %462 = vsyncpa [#allocation5], 1 }

</bundles_post_ra>
